<compile_context>
chip_gen: v7x
topology: tpu7x:2x2x1
jax: 0.10.0
libtpu: 0.0.40
codegen_flags: <defaults>
</compile_context>

<pallas_src>
import functools

import jax
import jax.numpy as jnp
from jax.experimental import pallas as pl
from jax.experimental.pallas import tpu as pltpu

# ---- Fixed (synthetic) architecture, matching RLCard no-limit-holdem ----
STATE_DIM = 54          # np.prod(env.state_shape) for 'no-limit-holdem'
NUM_ACTIONS = 5         # fold / check-call / raise-half / raise-pot / all-in
MLP_LAYERS = [64, 64]   # mlp_layers argument
BN_EPS = 1e-5

# ---- Padded / tiled sizes ----
D_PAD = 64              # feature dim padded 54 -> 64 (clean K for the first matmul)
HIDDEN = MLP_LAYERS[-1]
OUT_PAD = 128           # action dim padded 5 -> 128 (lane-dense output stores)
MAX_BATCH_TILE = 256    # per-tile rows; 256*128*4B = 128 KiB per buffered block
                        # -> fits easily inside v7x's 32 MiB scoped VMEM too.


def _round_up(n, m):
    return ((n + m - 1) // m) * m


def _estimator_kernel(x_ref, scale_ref, shift_ref,
                      w1_ref, b1_ref, w2_ref, b2_ref, w3_ref, b3_ref,
                      out_ref):
    """One (batch_tile, D_PAD) -> (batch_tile, OUT_PAD) forward step.

    BatchNorm is already folded into per-feature scale/shift, so the body is
    FMA -> (matmul, tanh) x2 -> matmul.  All weights/vectors are VMEM-resident
    across grid steps (their index_map is constant).
    """
    # BatchNorm1d folded to a single fused multiply-add (VPU).
    h = x_ref[...] * scale_ref[...] + shift_ref[...]

    # Hidden layer 1: Linear -> Tanh  (MXU + EUP)
    h = jnp.tanh(jnp.dot(h, w1_ref[...], preferred_element_type=jnp.float32)
                 + b1_ref[...])

    # Hidden layer 2: Linear -> Tanh
    h = jnp.tanh(jnp.dot(h, w2_ref[...], preferred_element_type=jnp.float32)
                 + b2_ref[...])

    # Final Linear (Q-values, zero-padded to 128 lanes).
    q = jnp.dot(h, w3_ref[...], preferred_element_type=jnp.float32) + b3_ref[...]
    out_ref[...] = q.astype(out_ref.dtype)


@jax.jit
def estimator_forward(x, params):
    """Run the EstimatorNetwork forward via a batch-tiled pallas_call.

    x: (B, STATE_DIM) float32
    params: dict with bn gamma/beta (STATE_DIM,), and 3 linear layers with
            weights stored as (in, out) and biases as (out,).
    """
    B = x.shape[0]
    xf = x.astype(jnp.float32)

    # ---- BatchNorm1d (training mode) stats over the WHOLE batch, in JAX ----
    # (hoisted out of the kernel so batch tiling stays correct)
    mean = jnp.mean(xf, axis=0)
    var = jnp.mean((xf - mean) ** 2, axis=0)                 # biased variance
    inv_std = jax.lax.rsqrt(var + BN_EPS)
    scale = params["gamma"] * inv_std                        # (STATE_DIM,)
    shift = params["beta"] - mean * scale                    # (STATE_DIM,)

    # ---- Zero-pad features / outputs to lane-friendly sizes ----
    scale_p = jnp.zeros((1, D_PAD), jnp.float32).at[0, :STATE_DIM].set(scale)
    shift_p = jnp.zeros((1, D_PAD), jnp.float32).at[0, :STATE_DIM].set(shift)
    w1_p = jnp.zeros((D_PAD, HIDDEN), jnp.float32).at[:STATE_DIM, :].set(params["w1"])
    b1_p = params["b1"].reshape(1, HIDDEN).astype(jnp.float32)
    w2_p = params["w2"].astype(jnp.float32)
    b2_p = params["b2"].reshape(1, HIDDEN).astype(jnp.float32)
    w3_p = jnp.zeros((HIDDEN, OUT_PAD), jnp.float32).at[:, :NUM_ACTIONS].set(params["w3"])
    b3_p = jnp.zeros((1, OUT_PAD), jnp.float32).at[0, :NUM_ACTIONS].set(params["b3"])

    # ---- Pad / tile the batch axis ----
    bt = min(MAX_BATCH_TILE, _round_up(B, 8))                # rows per grid step
    b_pad = _round_up(B, bt)
    x_p = jnp.zeros((b_pad, D_PAD), jnp.float32).at[:B, :STATE_DIM].set(xf)
    grid = (b_pad // bt,)

    def resident(shape):
        # Same block every grid step -> stays VMEM-resident (no re-DMA).
        return pl.BlockSpec(shape, lambda i: (0, 0))

    grid_spec = pltpu.PrefetchScalarGridSpec(
        num_scalar_prefetch=0,
        grid=grid,
        in_specs=[
            pl.BlockSpec((bt, D_PAD), lambda i: (i, 0)),     # x tile (pipelined)
            resident((1, D_PAD)),                            # scale
            resident((1, D_PAD)),                            # shift
            resident((D_PAD, HIDDEN)),                       # w1
            resident((1, HIDDEN)),                           # b1
            resident((HIDDEN, HIDDEN)),                      # w2
            resident((1, HIDDEN)),                           # b2
            resident((HIDDEN, OUT_PAD)),                     # w3
            resident((1, OUT_PAD)),                          # b3
        ],
        out_specs=pl.BlockSpec((bt, OUT_PAD), lambda i: (i, 0)),
    )

    flops = 2 * b_pad * (D_PAD * HIDDEN + HIDDEN * HIDDEN + HIDDEN * OUT_PAD)
    cost = pl.CostEstimate(
        flops=flops,
        transcendentals=2 * b_pad * HIDDEN,
        bytes_accessed=4 * (b_pad * (D_PAD + OUT_PAD)
                            + D_PAD * HIDDEN + HIDDEN * HIDDEN + HIDDEN * OUT_PAD),
    )

    out_padded = pl.pallas_call(
        _estimator_kernel,
        out_shape=jax.ShapeDtypeStruct((b_pad, OUT_PAD), jnp.float32),
        grid_spec=grid_spec,
        compiler_params=pltpu.CompilerParams(
            dimension_semantics=("parallel",),               # v7x: both TCs
        ),
        cost_estimate=cost,
    )(x_p, scale_p, shift_p, w1_p, b1_p, w2_p, b2_p, w3_p, b3_p)

    return out_padded[:B, :NUM_ACTIONS]


def init_params(key):
    """Deterministic synthetic parameter init (PyTorch-like uniform ranges)."""
    dims = [STATE_DIM] + MLP_LAYERS + [NUM_ACTIONS]
    keys = jax.random.split(key, 2 * (len(dims) - 1))
    params = {
        # BatchNorm1d defaults: gamma=1, beta=0
        "gamma": jnp.ones((STATE_DIM,), jnp.float32),
        "beta": jnp.zeros((STATE_DIM,), jnp.float32),
    }
    for i in range(len(dims) - 1):
        fan_in, fan_out = dims[i], dims[i + 1]
        bound = 1.0 / (float(fan_in) ** 0.5)
        w = jax.random.uniform(keys[2 * i], (fan_in, fan_out),
                               jnp.float32, -bound, bound)
        b = jax.random.uniform(keys[2 * i + 1], (fan_out,),
                               jnp.float32, -bound, bound)
        params[f"w{i + 1}"] = w
        params[f"b{i + 1}"] = b
    return params


def reference_forward(x, params):
    """Pure-JAX reference of the same forward pass (for correctness check)."""
    mean = jnp.mean(x, axis=0, keepdims=True)
    var = jnp.mean((x - mean) ** 2, axis=0, keepdims=True)
    h = (x - mean) / jnp.sqrt(var + BN_EPS) * params["gamma"] + params["beta"]
    h = jnp.tanh(h @ params["w1"] + params["b1"])
    h = jnp.tanh(h @ params["w2"] + params["b2"])
    return h @ params["w3"] + params["b3"]


if __name__ == "__main__":
    key = jax.random.PRNGKey(0)
    k_x, k_x2, k_p = jax.random.split(key, 3)
    params = init_params(k_p)

    # Small batch: single grid step.
    batch = 32
    x = jax.random.normal(k_x, (batch, STATE_DIM), jnp.float32)
    out = jax.block_until_ready(estimator_forward(x, params))
    ref = reference_forward(x, params)
    assert out.shape == (batch, NUM_ACTIONS)
    assert jnp.allclose(out, ref, atol=1e-4, rtol=1e-4), "mismatch vs reference (B=32)"

    # Larger batch: exercises the multi-tile pipelined / parallel grid path.
    batch2 = 500  # non-multiple of the 256-row tile -> padded grid of 2 steps
    x2 = jax.random.normal(k_x2, (batch2, STATE_DIM), jnp.float32)
    out2 = jax.block_until_ready(estimator_forward(x2, params))
    ref2 = reference_forward(x2, params)
    assert out2.shape == (batch2, NUM_ACTIONS)
    assert jnp.allclose(out2, ref2, atol=1e-4, rtol=1e-4), "mismatch vs reference (B=500)"

    print("KERNEL_OK")
</pallas_src>

<mosaic_0001>
module attributes {stable_mosaic.version = 11 : i64} {
  func.func @_estimator_kernel(%arg0: i32, %arg1: memref<32x64xf32, #tpu.memory_space<vmem>>, %arg2: memref<1x64xf32, #tpu.memory_space<vmem>>, %arg3: memref<1x64xf32, #tpu.memory_space<vmem>>, %arg4: memref<64x64xf32, #tpu.memory_space<vmem>>, %arg5: memref<1x64xf32, #tpu.memory_space<vmem>>, %arg6: memref<64x64xf32, #tpu.memory_space<vmem>>, %arg7: memref<1x64xf32, #tpu.memory_space<vmem>>, %arg8: memref<64x128xf32, #tpu.memory_space<vmem>>, %arg9: memref<1x128xf32, #tpu.memory_space<vmem>>, %arg10: memref<32x128xf32, #tpu.memory_space<vmem>>) attributes {dimension_semantics = [#tpu.dimension_semantics<parallel>], iteration_bounds = array<i64: 1>, scalar_prefetch = 0 : i64, scratch_operands = 0 : i64, tpu.core_type = #tpu.core_type<tc>, window_params = [{transform_indices = @transform_0, window_bounds = array<i64: 32, 64>}, {pipeline_mode = #tpu.pipeline_mode<synchronous>, transform_indices = @transform_1, window_bounds = array<i64: 1, 64>}, {pipeline_mode = #tpu.pipeline_mode<synchronous>, transform_indices = @transform_2, window_bounds = array<i64: 1, 64>}, {pipeline_mode = #tpu.pipeline_mode<synchronous>, transform_indices = @transform_3, window_bounds = array<i64: 64, 64>}, {pipeline_mode = #tpu.pipeline_mode<synchronous>, transform_indices = @transform_4, window_bounds = array<i64: 1, 64>}, {pipeline_mode = #tpu.pipeline_mode<synchronous>, transform_indices = @transform_5, window_bounds = array<i64: 64, 64>}, {pipeline_mode = #tpu.pipeline_mode<synchronous>, transform_indices = @transform_6, window_bounds = array<i64: 1, 64>}, {pipeline_mode = #tpu.pipeline_mode<synchronous>, transform_indices = @transform_7, window_bounds = array<i64: 64, 128>}, {pipeline_mode = #tpu.pipeline_mode<synchronous>, transform_indices = @transform_8, window_bounds = array<i64: 1, 128>}, {transform_indices = @transform_9, window_bounds = array<i64: 32, 128>}]} {
    %c0 = arith.constant 0 : index
    %c0_0 = arith.constant 0 : index
    %0 = vector.load %arg1[%c0, %c0_0] : memref<32x64xf32, #tpu.memory_space<vmem>>, vector<32x64xf32>
    %c0_1 = arith.constant 0 : index
    %c0_2 = arith.constant 0 : index
    %1 = vector.load %arg2[%c0_1, %c0_2] : memref<1x64xf32, #tpu.memory_space<vmem>>, vector<1x64xf32>
    %2 = vector.broadcast %1 : vector<1x64xf32> to vector<32x64xf32>
    %3 = arith.mulf %0, %2 : vector<32x64xf32>
    %c0_3 = arith.constant 0 : index
    %c0_4 = arith.constant 0 : index
    %4 = vector.load %arg3[%c0_3, %c0_4] : memref<1x64xf32, #tpu.memory_space<vmem>>, vector<1x64xf32>
    %5 = vector.broadcast %4 : vector<1x64xf32> to vector<32x64xf32>
    %6 = arith.addf %3, %5 : vector<32x64xf32>
    %c0_5 = arith.constant 0 : index
    %c0_6 = arith.constant 0 : index
    %7 = vector.load %arg4[%c0_5, %c0_6] : memref<64x64xf32, #tpu.memory_space<vmem>>, vector<64x64xf32>
    %cst = arith.constant dense<0.000000e+00> : vector<32x64xf32>
    %8 = tpu.matmul %6, %7, %cst {dimension_numbers = #tpu.dot_dimension_numbers<[1], [0], [0], [1], [0, 0, 1, 1], [], []>} : vector<32x64xf32>, vector<64x64xf32>, vector<32x64xf32> -> vector<32x64xf32>
    %c0_7 = arith.constant 0 : index
    %c0_8 = arith.constant 0 : index
    %9 = vector.load %arg5[%c0_7, %c0_8] : memref<1x64xf32, #tpu.memory_space<vmem>>, vector<1x64xf32>
    %10 = vector.broadcast %9 : vector<1x64xf32> to vector<32x64xf32>
    %11 = arith.addf %8, %10 : vector<32x64xf32>
    %12 = math.tanh %11 : vector<32x64xf32>
    %c0_9 = arith.constant 0 : index
    %c0_10 = arith.constant 0 : index
    %13 = vector.load %arg6[%c0_9, %c0_10] : memref<64x64xf32, #tpu.memory_space<vmem>>, vector<64x64xf32>
    %cst_11 = arith.constant dense<0.000000e+00> : vector<32x64xf32>
    %14 = tpu.matmul %12, %13, %cst_11 {dimension_numbers = #tpu.dot_dimension_numbers<[1], [0], [0], [1], [0, 0, 1, 1], [], []>} : vector<32x64xf32>, vector<64x64xf32>, vector<32x64xf32> -> vector<32x64xf32>
    %c0_12 = arith.constant 0 : index
    %c0_13 = arith.constant 0 : index
    %15 = vector.load %arg7[%c0_12, %c0_13] : memref<1x64xf32, #tpu.memory_space<vmem>>, vector<1x64xf32>
    %16 = vector.broadcast %15 : vector<1x64xf32> to vector<32x64xf32>
    %17 = arith.addf %14, %16 : vector<32x64xf32>
    %18 = math.tanh %17 : vector<32x64xf32>
    %c0_14 = arith.constant 0 : index
    %c0_15 = arith.constant 0 : index
    %19 = vector.load %arg8[%c0_14, %c0_15] : memref<64x128xf32, #tpu.memory_space<vmem>>, vector<64x128xf32>
    %cst_16 = arith.constant dense<0.000000e+00> : vector<32x128xf32>
    %20 = tpu.matmul %18, %19, %cst_16 {dimension_numbers = #tpu.dot_dimension_numbers<[1], [0], [0], [1], [0, 0, 1, 1], [], []>} : vector<32x64xf32>, vector<64x128xf32>, vector<32x128xf32> -> vector<32x128xf32>
    %c0_17 = arith.constant 0 : index
    %c0_18 = arith.constant 0 : index
    %21 = vector.load %arg9[%c0_17, %c0_18] : memref<1x128xf32, #tpu.memory_space<vmem>>, vector<1x128xf32>
    %22 = vector.broadcast %21 : vector<1x128xf32> to vector<32x128xf32>
    %23 = arith.addf %20, %22 : vector<32x128xf32>
    %c0_19 = arith.constant 0 : index
    %c0_20 = arith.constant 0 : index
    %24 = vector.load %arg10[%c0_19, %c0_20] : memref<32x128xf32, #tpu.memory_space<vmem>>, vector<32x128xf32>
    tpu.vector_store %arg10[%c0_19, %c0_20], %23 {strides = array<i32>} : memref<32x128xf32, #tpu.memory_space<vmem>>, vector<32x128xf32>,
    return
  }
  func.func @transform_0(%arg0: i32) -> (i32, i32) {
    %c0_i32 = arith.constant 0 : i32
    %c0_i32_0 = arith.constant 0 : i32
    return %arg0, %c0_i32 : i32, i32
  }
  func.func @transform_1(%arg0: i32) -> (i32, i32) {
    %c0_i32 = arith.constant 0 : i32
    %c0_i32_0 = arith.constant 0 : i32
    %c0_i32_1 = arith.constant 0 : i32
    return %c0_i32, %c0_i32_0 : i32, i32
  }
  func.func @transform_2(%arg0: i32) -> (i32, i32) {
    %c0_i32 = arith.constant 0 : i32
    %c0_i32_0 = arith.constant 0 : i32
    %c0_i32_1 = arith.constant 0 : i32
    return %c0_i32, %c0_i32_0 : i32, i32
  }
  func.func @transform_3(%arg0: i32) -> (i32, i32) {
    %c0_i32 = arith.constant 0 : i32
    %c0_i32_0 = arith.constant 0 : i32
    %c0_i32_1 = arith.constant 0 : i32
    return %c0_i32, %c0_i32_0 : i32, i32
  }
  func.func @transform_4(%arg0: i32) -> (i32, i32) {
    %c0_i32 = arith.constant 0 : i32
    %c0_i32_0 = arith.constant 0 : i32
    %c0_i32_1 = arith.constant 0 : i32
    return %c0_i32, %c0_i32_0 : i32, i32
  }
  func.func @transform_5(%arg0: i32) -> (i32, i32) {
    %c0_i32 = arith.constant 0 : i32
    %c0_i32_0 = arith.constant 0 : i32
    %c0_i32_1 = arith.constant 0 : i32
    return %c0_i32, %c0_i32_0 : i32, i32
  }
  func.func @transform_6(%arg0: i32) -> (i32, i32) {
    %c0_i32 = arith.constant 0 : i32
    %c0_i32_0 = arith.constant 0 : i32
    %c0_i32_1 = arith.constant 0 : i32
    return %c0_i32, %c0_i32_0 : i32, i32
  }
  func.func @transform_7(%arg0: i32) -> (i32, i32) {
    %c0_i32 = arith.constant 0 : i32
    %c0_i32_0 = arith.constant 0 : i32
    %c0_i32_1 = arith.constant 0 : i32
    return %c0_i32, %c0_i32_0 : i32, i32
  }
  func.func @transform_8(%arg0: i32) -> (i32, i32) {
    %c0_i32 = arith.constant 0 : i32
    %c0_i32_0 = arith.constant 0 : i32
    %c0_i32_1 = arith.constant 0 : i32
    return %c0_i32, %c0_i32_0 : i32, i32
  }
  func.func @transform_9(%arg0: i32) -> (i32, i32) {
    %c0_i32 = arith.constant 0 : i32
    %c0_i32_0 = arith.constant 0 : i32
    return %arg0, %c0_i32 : i32, i32
  }
}

</mosaic_0001>

<bundles_post_ra>
// kernel: estimator_forward.1
= control target key start
LH: loop header
LB: loop body
LE: loop exit
PB: predicated region body
PF: predicated region fallthrough
CT: control target
= control target key end

     0   :  { %vm73_vm0 = vcmask 523264   ;;  %s775_s3 = inlined_call_operand.vmem [shape: f32[64,64], index: 3, kind: input, shape index: {}]   ;;  %s776_s0 = inlined_call_operand.vmem [shape: f32[32,64], index: 0, kind: input, shape index: {}]   ;;  %s777_s1 = inlined_call_operand.vmem [shape: f32[1,64], index: 1, kind: input, shape index: {}]   ;;  %s778_s2 = inlined_call_operand.vmem [shape: f32[1,64], index: 2, kind: input, shape index: {}]   ;;  %s779_s5 = inlined_call_operand.vmem [shape: f32[64,64], index: 5, kind: input, shape index: {}]   ;;  %s780_s4 = inlined_call_operand.vmem [shape: f32[1,64], index: 4, kind: input, shape index: {}]   ;;  %s781_s7 = inlined_call_operand.vmem [shape: f32[64,128], index: 7, kind: input, shape index: {}]   ;;  %s782_s6 = inlined_call_operand.vmem [shape: f32[1,64], index: 6, kind: input, shape index: {}]   ;;  %s783_s8 = inlined_call_operand.vmem [shape: f32[1,128], index: 8, kind: input, shape index: {}]   ;;  %s784_s9 = inlined_call_operand.vmem [shape: f32[32,128], index: 9, kind: output, shape index: {}]  }
   0x1   :  { %v58_v0 = vld [vmem:[%s775_s3] sm:$0xff]  ;;  %v59_v1 = vld [vmem:[%s775_s3 + $0x8] sm:$0xff]  ;;  %v60_v2 = vld [vmem:[%s775_s3 + $0x10] sm:$0xff] }
   0x2   :  { %v530_v3 = vpack.c.bf16 %v59_v1, %v58_v0  ;;  %v61_v4 = vld [vmem:[%s775_s3 + $0x18] sm:$0xff]  ;;  %v62_v6 = vld [vmem:[%s775_s3 + $0x20] sm:$0xff]  ;;  %v63_v7 = vld [vmem:[%s775_s3 + $0x28] sm:$0xff] }
   0x3   :  { %v534_v5 = vpack.c.bf16 %v61_v4, %v60_v2  ;;  %v32_v8 = vld [vmem:[%s776_s0] sm:$0xff]  ;;  %v538_v12 = vpack.c.bf16 %v63_v7, %v62_v6  ;;  %v64_v13 = vld [vmem:[%s775_s3 + $0x30] sm:$0xff]  ;;  %v65_v14 = vld [vmem:[%s775_s3 + $0x38] sm:$0xff] }
   0x4   :  { %531 = vmatprep.subr.bf16.mxu0 %v530_v3  ;;  %v411_v9 = vld [vmem:[%s777_s1] ss:$0 sm:$0xff]  ;;  %v33_v16 = vld [vmem:[%s776_s0 + $0x8] sm:$0xff]  ;;  %v542_v17 = vpack.c.bf16 %v65_v14, %v64_v13  ;;  %v34_v18 = vld [vmem:[%s776_s0 + $0x10] sm:$0xff] }
   0x5   :  { %v412_v10 = vld [vmem:[%s778_s2] ss:$0 sm:$0xff]  ;;  %533 = vmatpush3.bf16.msra.mxu0 %v530_v3  ;;  %v43_v11 = vmul.f32 %v411_v9, %v32_v8  ;;  %v44_v19 = vmul.f32 %v411_v9, %v33_v16  ;;  %v45_v20 = vmul.f32 %v411_v9, %v34_v18  ;;  %v35_v21 = vld [vmem:[%s776_s0 + $0x18] sm:$0xff]  ;;  %v176_v27 = vld [vmem:[%s779_s5 + $0x8] sm:$0xff] }
   0x6   :  { %535 = vmatprep.subr.bf16.mxu0 %v534_v5  ;;  %v46_v23 = vmul.f32 %v411_v9, %v35_v21  ;;  %v175_v26 = vld [vmem:[%s779_s5] sm:$0xff]  ;;  %v177_v29 = vld [vmem:[%s779_s5 + $0x10] sm:$0xff]  ;;  %v178_v30 = vld [vmem:[%s779_s5 + $0x18] sm:$0xff] }
   0x7   :  { %v54_v15 = vadd.f32 %v412_v10, %v43_v11  ;;  %v55_v22 = vadd.f32 %v412_v10, %v44_v19  ;;  %v56_v24 = vadd.f32 %v412_v10, %v45_v20  ;;  %v546_v28 = vpack.c.bf16 %v176_v27, %v175_v26  ;;  %v179_v32 = vld [vmem:[%s779_s5 + $0x20] sm:$0xff]  ;;  %v180_v33 = vld [vmem:[%s779_s5 + $0x28] sm:$0xff]  ;;  %v181_v35 = vld [vmem:[%s779_s5 + $0x30] sm:$0xff] }
   0x8   :  { %v57_v25 = vadd.f32 %v412_v10, %v46_v23  ;;  %v550_v31 = vpack.c.bf16 %v178_v30, %v177_v29  ;;  %v554_v34 = vpack.c.bf16 %v180_v33, %v179_v32  ;;  %v182_v36 = vld [vmem:[%s779_s5 + $0x38] sm:$0xff]  ;;  %v413_v38 = vld [vmem:[%s780_s4] ss:$0 sm:$0xff]  ;;  %v292_v52 = vld [vmem:[%s781_s7 + $0x8] sm:$0xff] }
   0x9   :  { %537 = vmatpush3.bf16.msra.mxu0 %v534_v5  ;;  %480 = vmatprep.mubr.msk.f32.mxu0 %vm73_vm0, %v54_v15  ;;  %v558_v37 = vpack.c.bf16 %v182_v36, %v181_v35  ;;  %v291_v51 = vld [vmem:[%s781_s7] sm:$0xff]  ;;  %v293_v54 = vld [vmem:[%s781_s7 + $0x10] sm:$0xff]  ;;  %v294_v55 = vld [vmem:[%s781_s7 + $0x18] sm:$0xff] }
   0xa   :  { %539 = vmatprep.subr.bf16.mxu0 %v538_v12  ;;  %547 = vmatprep.subr.bf16.mxu1 %v546_v28  ;;  %v562_v53 = vpack.c.bf16 %v292_v52, %v291_v51  ;;  %v566_v56 = vpack.c.bf16 %v294_v55, %v293_v54  ;;  %v295_v57 = vld [vmem:[%s781_s7 + $0x20] sm:$0xff]  ;;  %v296_v58 = vld [vmem:[%s781_s7 + $0x28] sm:$0xff]  ;;  %v297_v60 = vld [vmem:[%s781_s7 + $0x30] sm:$0xff] }
   0xb   :  { %549 = vmatpush3.bf16.msra.mxu1 %v546_v28  ;;  %v570_v59 = vpack.c.bf16 %v296_v58, %v295_v57  ;;  %v298_v61 = vld [vmem:[%s781_s7 + $0x38] sm:$0xff]  ;;  %v418_v63 = vld [vmem:[%s782_s6] ss:$0 sm:$0xff] }
   0xc   :  { %551 = vmatprep.subr.bf16.mxu1 %v550_v31  ;;  %v574_v62 = vpack.c.bf16 %v298_v61, %v297_v60 }
   0xd   :  { %541 = vmatpush3.bf16.msra.mxu0 %v538_v12  ;;  %v423_v12 = vld [vmem:[%s783_s8] ss:$0 sm:$0xff] }
   0xe   :  { %543 = vmatprep.subr.bf16.mxu0 %v542_v17 }
   0xf   :  { %553 = vmatpush3.bf16.msra.mxu1 %v550_v31 }
  0x10   :  { %555 = vmatprep.subr.bf16.mxu1 %v554_v34 }
  0x11   :  { %545 = vmatpush3.bf16.msra.mxu0 %v542_v17 }
  0x12   :  { %563 = vmatprep.subr.bf16.mxu0 %v562_v53 }
  0x13   :  { %557 = vmatpush3.bf16.msra.mxu1 %v554_v34 }
  0x14   :  { %481 = vmatmul.mubr.msk.f32.vlgmr.msra.gmra.mrb[0].mxu0 %vm73_vm0, %v55_v22  ;;  %559 = vmatprep.subr.bf16.mxu1 %v558_v37 }
  0x15   :  { %483 = vmatprep.mubr.msk.f32.mxu0 %vm73_vm0, %v56_v24  ;;  %565 = vmatpush3.bf16.msra.mxu0 %v562_v53 }
  0x16   :  { %567 = vmatprep.subr.bf16.mxu0 %v566_v56 }
  0x17   :  { %561 = vmatpush3.bf16.msra.mxu1 %v558_v37 }
  0x18   :  { %484 = vmatmul.mubr.msk.f32.gmra.mrb[2].mxu0 %vm73_vm0, %v57_v25  ;;  %578 = vmatprep.subr.bf16.mxu1 %v562_v53 }
  0x19   :  { %569 = vmatpush3.bf16.msra.mxu0 %v566_v56 }
  0x1a   :  { %571 = vmatprep.subr.bf16.mxu0 %v570_v59 }
  0x1d   :  { %573 = vmatpush3.bf16.msra.mxu0 %v570_v59 }
  0x1e   :  { %575 = vmatprep.subr.bf16.mxu0 %v574_v62 }
  0x21   :  { %577 = vmatpush3.bf16.msra.mxu0 %v574_v62 }
  0xe7   :  { %v482_v39 = vpop.f32.mrb[0].mxu0 }
  0xe8   :  { %v158_v40 = vadd.f32 %v482_v39, %v413_v38  ;;  %v152_v41 = vpop.f32.mrb[1].mxu0 }
  0xe9   :  { %v153_v42 = vadd.f32 %v413_v38, %v152_v41 }
  0xeb   :  { %586 = vtanh.f32 %v153_v42  ;;  %v485_v43 = vpop.f32.mrb[2].mxu0 }
  0xec   :  { %588 = vtanh.f32 %v158_v40  ;;  %v168_v44 = vadd.f32 %v485_v43, %v413_v38  ;;  %v162_v45 = vpop.f32.mrb[3].mxu0 }
  0xed   :  { %v163_v46 = vadd.f32 %v413_v38, %v162_v45 }
  0xef   :  { %590 = vtanh.f32 %v163_v46 }
  0xf0   :  { %592 = vtanh.f32 %v168_v44 }
  0xf5   :  { %v587_v47 = vpop.eup %586 }
  0xf6   :  { %v589_v48 = vpop.eup %588  ;;  %502 = vmatprep.mubr.msk.f32.mxu1 %vm73_vm0, %v587_v47 }
  0xf7   :  { %503 = vmatmul.mubr.msk.f32.vlgmr.msra.gmra.mrb[0].mxu1 %vm73_vm0, %v589_v48 }
  0xf8   :  { %582 = vmatpush3.bf16.msra.mxu1 %v562_v53 }
  0xf9   :  { %v591_v49 = vpop.eup %590  ;;  %579 = vmatprep.subr.bf16.mxu1 %v566_v56 }
  0xfa   :  { %v593_v50 = vpop.eup %592  ;;  %505 = vmatprep.mubr.msk.f32.mxu1 %vm73_vm0, %v591_v49 }
  0xfb   :  { %506 = vmatmul.mubr.msk.f32.gmra.mrb[2].mxu1 %vm73_vm0, %v593_v50 }
  0xfc   :  { %583 = vmatpush3.bf16.msra.mxu1 %v566_v56 }
  0xfd   :  { %580 = vmatprep.subr.bf16.mxu1 %v570_v59 }
 0x100   :  { %584 = vmatpush3.bf16.msra.mxu1 %v570_v59 }
 0x101   :  { %581 = vmatprep.subr.bf16.mxu1 %v574_v62 }
 0x104   :  { %585 = vmatpush3.bf16.msra.mxu1 %v574_v62 }
 0x1ca   :  { %v504_v0 = vpop.f32.mrb[0].mxu1 }
 0x1cb   :  { %v274_v1 = vadd.f32 %v504_v0, %v418_v63  ;;  %v268_v2 = vpop.f32.mrb[1].mxu1 }
 0x1cc   :  { %v269_v3 = vadd.f32 %v418_v63, %v268_v2 }
 0x1ce   :  { %594 = vtanh.f32 %v269_v3  ;;  %v507_v4 = vpop.f32.mrb[2].mxu1 }
 0x1cf   :  { %596 = vtanh.f32 %v274_v1  ;;  %v284_v5 = vadd.f32 %v507_v4, %v418_v63  ;;  %v278_v6 = vpop.f32.mrb[3].mxu1 }
 0x1d0   :  { %v279_v7 = vadd.f32 %v418_v63, %v278_v6 }
 0x1d2   :  { %598 = vtanh.f32 %v279_v7 }
 0x1d3   :  { %600 = vtanh.f32 %v284_v5 }
 0x1d8   :  { %v595_v8 = vpop.eup %594 }
 0x1d9   :  { %v597_v9 = vpop.eup %596  ;;  %524 = vmatprep.mubr.msk.f32.mxu0 %vm73_vm0, %v595_v8 }
 0x1da   :  { %525 = vmatmul.mubr.msk.f32.vlgmr.msra.gmra.mrb[4].mxu0 %vm73_vm0, %v597_v9 }
 0x1dc   :  { %v599_v10 = vpop.eup %598 }
 0x1dd   :  { %v601_v11 = vpop.eup %600  ;;  %527 = vmatprep.mubr.msk.f32.mxu1 %vm73_vm0, %v599_v10 }
 0x1de   :  { %528 = vmatmul.mubr.msk.f32.vlgmr.msra.gmra.mrb[4].mxu1 %vm73_vm0, %v601_v11 }
 0x2ad   :  { %v526_v13 = vpop.f32.mrb[4].mxu0 }
 0x2ae   :  { %v390_v14 = vadd.f32 %v526_v13, %v423_v12  ;;  %v384_v15 = vpop.f32.mrb[5].mxu0 }
 0x2af   :  { %v385_v16 = vadd.f32 %v423_v12, %v384_v15 }
 0x2b0   :  { %404 = vst [vmem:[%s784_s9 + $0x8] sm:$0xff] %v390_v14 }
 0x2b1   :  { %403 = vst [vmem:[%s784_s9] sm:$0xff] %v385_v16  ;;  %v529_v17 = vpop.f32.mrb[4].mxu1 }
 0x2b2   :  { %v400_v18 = vadd.f32 %v529_v17, %v423_v12  ;;  %v394_v19 = vpop.f32.mrb[5].mxu1 }
 0x2b3   :  { %v395_v20 = vadd.f32 %v423_v12, %v394_v19 }
 0x2b4   :  { %406 = vst [vmem:[%s784_s9 + $0x18] sm:$0xff] %v400_v18 }
 0x2b5   :  { %405 = vst [vmem:[%s784_s9 + $0x10] sm:$0xff] %v395_v20 }

</bundles_post_ra>
